<compile_context>
chip_gen: v7x
topology: tpu7x:2x2x1
jax: 0.10.0
libtpu: 0.0.40
codegen_flags: <defaults>
</compile_context>

<pallas_src>
import functools

import jax
import jax.numpy as jnp
from jax.experimental import pallas as pl
from jax.experimental.pallas import tpu as pltpu


def _round_up(x: int, m: int) -> int:
    return ((x + m - 1) // m) * m


def _contrastive_tile_kernel(row_emb_ref, col_emb_ref, lab_row_ref, lab_col_ref,
                             pos_ref, neg_ref, *, margin, n_valid, tile, padded):
    c = pl.program_id(0)   # column-tile index: outer, "parallel" (output axis)
    r = pl.program_id(1)   # row-tile index:    inner, "arbitrary" (accumulation)

    @pl.when(r == 0)
    def _init():
        # Lane-dense (1, tile) accumulators stay resident across the r sweep.
        pos_ref[...] = jnp.zeros_like(pos_ref)
        neg_ref[...] = jnp.zeros_like(neg_ref)

    # Gram matrix on the MXU: bf16 operands (pre-normalized in the wrapper),
    # f32 accumulation.
    gram = jax.lax.dot_general(
        row_emb_ref[...], col_emb_ref[...], (((1,), (1,)), ((), ())),
        preferred_element_type=jnp.float32)                       # (tile, tile)
    # Unit-norm rows => squared distance = 2 - 2 <a, b>.
    d2 = jnp.maximum(2.0 - 2.0 * gram, 0.0)
    dist = jnp.sqrt(d2) + 1e-6
    hinge = jnp.maximum(margin - dist, 1e-6)

    # Pair selection (booleans only).  Self pairs are NOT excluded here; their
    # exact contribution is subtracted in the wrapper.
    eq = lab_row_ref[...] == lab_col_ref[...]                     # (tile, tile)
    pos_sel = eq
    neg_sel = jnp.logical_not(eq)
    if padded:  # static Python branch: bounds masks only emitted when needed
        row_valid = (r * tile + jax.lax.broadcasted_iota(
            jnp.int32, (tile, 1), 0)) < n_valid
        col_valid = (c * tile + jax.lax.broadcasted_iota(
            jnp.int32, (1, tile), 1)) < n_valid
        valid = jnp.logical_and(row_valid, col_valid)
        pos_sel = jnp.logical_and(pos_sel, valid)
        neg_sel = jnp.logical_and(neg_sel, valid)

    # Sublane-axis (axis=0) reduction -> lane-dense (1, tile) running sums.
    pos_ref[...] += jnp.sum(jnp.where(pos_sel, d2, 0.0),
                            axis=0, keepdims=True)
    neg_ref[...] += jnp.sum(jnp.where(neg_sel, hinge * hinge, 0.0),
                            axis=0, keepdims=True)


def contrastive_loss_v3(embeddings, labels, margin: float = 1.0,
                        block_size: int = 512):
    """embeddings: (N, D) float; labels: (N,) or (N, 1) int. Returns scalar f32."""
    x = jnp.asarray(embeddings, jnp.float32)
    n, d = x.shape
    lab = jnp.asarray(labels, jnp.int32).reshape(-1)

    # --- L2-normalize once (F.normalize semantics: x / max(||x||_2, 1e-6)) ---
    norm = jnp.sqrt(jnp.sum(x * x, axis=1, keepdims=True))
    xn_bf = (x / jnp.maximum(norm, 1e-6)).astype(jnp.bfloat16)

    # --- tiling (multiples of 128 for lane-dense accumulators & stores) ------
    block_size = max(128, _round_up(int(block_size), 128))
    tile = min(block_size, _round_up(n, 128))
    n_pad = _round_up(n, tile)
    padded = n_pad != n
    n_tiles = n_pad // tile

    x_p = jnp.pad(xn_bf, ((0, n_pad - n), (0, 0)))
    lab_p = jnp.pad(lab, (0, n_pad - n))
    lab_rows = lab_p.reshape(n_pad, 1)
    lab_cols = lab_p.reshape(1, n_pad)

    kernel = functools.partial(
        _contrastive_tile_kernel,
        margin=float(margin), n_valid=n, tile=tile, padded=padded)

    acc_shape = jax.ShapeDtypeStruct((1, n_pad), jnp.float32)
    acc_spec = pl.BlockSpec((1, tile), lambda c, r: (0, c))

    pos_part, neg_part = pl.pallas_call(
        kernel,
        out_shape=(acc_shape, acc_shape),
        grid=(n_tiles, n_tiles),
        in_specs=[
            pl.BlockSpec((tile, d), lambda c, r: (r, 0)),   # row embedding tile
            pl.BlockSpec((tile, d), lambda c, r: (c, 0)),   # col embedding tile
            pl.BlockSpec((tile, 1), lambda c, r: (r, 0)),   # row labels (column vec)
            pl.BlockSpec((1, tile), lambda c, r: (0, c)),   # col labels (row vec)
        ],
        out_specs=(acc_spec, acc_spec),
        compiler_params=pltpu.CompilerParams(
            dimension_semantics=("parallel", "arbitrary"),
            vmem_limit_bytes=48 * 1024 * 1024,
        ),
    )(x_p, x_p, lab_rows, lab_cols)

    # --- wrapper-side finalization (O(N) / O(N log N), tiny) -----------------
    # Self-pair correction: the kernel sums d2 over ALL equal-label pairs
    # including self pairs; subtract the diagonal's contribution computed from
    # the same bf16 rows the kernel saw (consistent up to summation order).
    xb = xn_bf.astype(jnp.float32)
    g_diag = jnp.sum(xb * xb, axis=1)
    diag_pos = jnp.sum(jnp.maximum(2.0 - 2.0 * g_diag, 0.0))

    # Analytical pair counts from labels: sum_c m_c^2 via sorted run lengths.
    lab_sorted = jnp.sort(lab)
    left = jnp.searchsorted(lab_sorted, lab_sorted, side="left")
    right = jnp.searchsorted(lab_sorted, lab_sorted, side="right")
    sum_m_sq = jnp.sum((right - left).astype(jnp.float32))   # = sum_c m_c^2
    pos_cnt = sum_m_sq - float(n)                             # sum_c m_c (m_c - 1)
    neg_cnt = float(n) * float(n) - sum_m_sq

    pos_sum = jnp.maximum(jnp.sum(pos_part) - diag_pos, 0.0)
    neg_sum = jnp.sum(neg_part)
    pos = pos_sum / jnp.maximum(pos_cnt, 1.0)
    neg = neg_sum / jnp.maximum(neg_cnt, 1.0)
    return pos + 0.5 * neg


def _reference_loss(embeddings, labels, margin: float = 1.0):
    """Pure-JAX f32 reference (deterministic all-pairs expectation)."""
    x = jnp.asarray(embeddings, jnp.float32)
    norm = jnp.sqrt(jnp.sum(x * x, axis=1, keepdims=True))
    xn = x / jnp.maximum(norm, 1e-6)
    sq = jnp.sum(xn * xn, axis=1)
    d2 = jnp.maximum(sq[:, None] + sq[None, :] - 2.0 * (xn @ xn.T), 0.0)
    dist = jnp.sqrt(d2) + 1e-6
    lab = jnp.asarray(labels, jnp.int32).reshape(-1, 1)
    eq = (lab == lab.T).astype(jnp.float32)
    eye = jnp.eye(lab.shape[0], dtype=jnp.float32)
    pos_mask = eq - eye
    neg_mask = 1.0 - eq
    pos = jnp.sum(dist ** 2 * pos_mask) / jnp.maximum(jnp.sum(pos_mask), 1.0)
    hinge = jnp.maximum(margin - dist, 1e-6)
    neg = jnp.sum(hinge ** 2 * neg_mask) / jnp.maximum(jnp.sum(neg_mask), 1.0)
    return pos + 0.5 * neg


if __name__ == "__main__":
    key = jax.random.PRNGKey(0)
    k1, k2, k3, k4, k5, k6 = jax.random.split(key, 6)

    # Small shapes consistent with the module: (n_samples, embedding_size).
    n_samples, embedding_size = 8, 32
    emb = jax.random.normal(k1, (n_samples, embedding_size), jnp.float32)
    lab = jax.random.randint(k2, (n_samples, 1), 0, 3, jnp.int32)
    loss = contrastive_loss_v3(emb, lab, margin=1.0)
    jax.block_until_ready(loss)
    ref = _reference_loss(emb, lab, margin=1.0)
    # bf16 Gram matmul => compare against the f32 reference with a loose tolerance.
    assert jnp.allclose(loss, ref, atol=2e-2, rtol=2e-2), (loss, ref)

    # Tile-unaligned case: 3x3 grid of 128x128 tiles, padding masks, cross-tile
    # accumulation on the inner "arbitrary" axis.
    n2, d2 = 300, 32
    emb2 = jax.random.normal(k3, (n2, d2), jnp.float32)
    lab2 = jax.random.randint(k4, (n2, 1), 0, 5, jnp.int32)
    loss2 = contrastive_loss_v3(emb2, lab2, margin=1.0, block_size=128)
    jax.block_until_ready(loss2)
    ref2 = _reference_loss(emb2, lab2, margin=1.0)
    assert jnp.allclose(loss2, ref2, atol=2e-2, rtol=2e-2), (loss2, ref2)

    # Tile-aligned case (padded=False static branch): 2x2 grid of 128 tiles.
    n3, d3 = 256, 32
    emb3 = jax.random.normal(k5, (n3, d3), jnp.float32)
    lab3 = jax.random.randint(k6, (n3, 1), 0, 4, jnp.int32)
    loss3 = contrastive_loss_v3(emb3, lab3, margin=1.0, block_size=128)
    jax.block_until_ready(loss3)
    ref3 = _reference_loss(emb3, lab3, margin=1.0)
    assert jnp.allclose(loss3, ref3, atol=2e-2, rtol=2e-2), (loss3, ref3)

    print("KERNEL_OK")
</pallas_src>

<mosaic_0001>
module attributes {stable_mosaic.version = 11 : i64} {
  func.func @_contrastive_tile_kernel(%arg0: i32, %arg1: i32, %arg2: memref<128x32xbf16, #tpu.memory_space<vmem>>, %arg3: memref<128x32xbf16, #tpu.memory_space<vmem>>, %arg4: memref<128x1xi32, #tpu.memory_space<vmem>>, %arg5: memref<1x128xi32, #tpu.memory_space<vmem>>, %arg6: memref<1x128xf32, #tpu.memory_space<vmem>>, %arg7: memref<1x128xf32, #tpu.memory_space<vmem>>) attributes {dimension_semantics = [#tpu.dimension_semantics<parallel>, #tpu.dimension_semantics<arbitrary>], iteration_bounds = array<i64: 1, 1>, scalar_prefetch = 0 : i64, scratch_operands = 0 : i64, tpu.core_type = #tpu.core_type<tc>, window_params = [{transform_indices = @transform_0, window_bounds = array<i64: 128, 32>}, {transform_indices = @transform_1, window_bounds = array<i64: 128, 32>}, {transform_indices = @transform_2, window_bounds = array<i64: 128, 1>}, {transform_indices = @transform_3, window_bounds = array<i64: 1, 128>}, {transform_indices = @transform_4, window_bounds = array<i64: 1, 128>}, {transform_indices = @transform_5, window_bounds = array<i64: 1, 128>}]} {
    %c0_i32 = arith.constant 0 : i32
    %0 = arith.cmpi eq, %arg1, %c0_i32 : i32
    %1 = arith.extui %0 : i1 to i32
    %c0_i32_0 = arith.constant 0 : i32
    %2 = arith.cmpi ne, %1, %c0_i32_0 : i32
    scf.if %2 {
      %cst_29 = arith.constant 0.000000e+00 : f32
      %57 = vector.broadcast %cst_29 : f32 to vector<1x128xf32>
      %c0_30 = arith.constant 0 : index
      %c0_31 = arith.constant 0 : index
      %58 = vector.load %arg6[%c0_30, %c0_31] : memref<1x128xf32, #tpu.memory_space<vmem>>, vector<1x128xf32>
      tpu.vector_store %arg6[%c0_30, %c0_31], %57 {strides = array<i32>} : memref<1x128xf32, #tpu.memory_space<vmem>>, vector<1x128xf32>,
      %cst_32 = arith.constant 0.000000e+00 : f32
      %59 = vector.broadcast %cst_32 : f32 to vector<1x128xf32>
      %c0_33 = arith.constant 0 : index
      %c0_34 = arith.constant 0 : index
      %60 = vector.load %arg7[%c0_33, %c0_34] : memref<1x128xf32, #tpu.memory_space<vmem>>, vector<1x128xf32>
      tpu.vector_store %arg7[%c0_33, %c0_34], %59 {strides = array<i32>} : memref<1x128xf32, #tpu.memory_space<vmem>>, vector<1x128xf32>,
    } else {
    }
    %c0 = arith.constant 0 : index
    %c0_1 = arith.constant 0 : index
    %3 = vector.load %arg2[%c0, %c0_1] : memref<128x32xbf16, #tpu.memory_space<vmem>>, vector<128x32xbf16>
    %c0_2 = arith.constant 0 : index
    %c0_3 = arith.constant 0 : index
    %4 = vector.load %arg3[%c0_2, %c0_3] : memref<128x32xbf16, #tpu.memory_space<vmem>>, vector<128x32xbf16>
    %cst = arith.constant dense<0.000000e+00> : vector<128x128xf32>
    %5 = tpu.matmul %3, %4, %cst {dimension_numbers = #tpu.dot_dimension_numbers<[1], [1], [0], [0], [0, 0, 1, 0], [], []>} : vector<128x32xbf16>, vector<128x32xbf16>, vector<128x128xf32> -> vector<128x128xf32>
    %cst_4 = arith.constant 2.000000e+00 : f32
    %6 = vector.broadcast %cst_4 : f32 to vector<128x128xf32>
    %7 = arith.mulf %6, %5 : vector<128x128xf32>
    %cst_5 = arith.constant 2.000000e+00 : f32
    %8 = vector.broadcast %cst_5 : f32 to vector<128x128xf32>
    %9 = arith.subf %8, %7 : vector<128x128xf32>
    %cst_6 = arith.constant 0.000000e+00 : f32
    %10 = vector.broadcast %cst_6 : f32 to vector<128x128xf32>
    %11 = arith.maximumf %9, %10 : vector<128x128xf32>
    %12 = math.sqrt %11 : vector<128x128xf32>
    %cst_7 = arith.constant 9.99999997E-7 : f32
    %13 = vector.broadcast %cst_7 : f32 to vector<128x128xf32>
    %14 = arith.addf %12, %13 : vector<128x128xf32>
    %cst_8 = arith.constant 1.000000e+00 : f32
    %15 = vector.broadcast %cst_8 : f32 to vector<128x128xf32>
    %16 = arith.subf %15, %14 : vector<128x128xf32>
    %cst_9 = arith.constant 9.99999997E-7 : f32
    %17 = vector.broadcast %cst_9 : f32 to vector<128x128xf32>
    %18 = arith.maximumf %16, %17 : vector<128x128xf32>
    %c0_10 = arith.constant 0 : index
    %c0_11 = arith.constant 0 : index
    %19 = vector.load %arg4[%c0_10, %c0_11] : memref<128x1xi32, #tpu.memory_space<vmem>>, vector<128x1xi32>
    %c0_12 = arith.constant 0 : index
    %c0_13 = arith.constant 0 : index
    %20 = vector.load %arg5[%c0_12, %c0_13] : memref<1x128xi32, #tpu.memory_space<vmem>>, vector<1x128xi32>
    %21 = vector.broadcast %19 : vector<128x1xi32> to vector<128x128xi32>
    %22 = vector.broadcast %20 : vector<1x128xi32> to vector<128x128xi32>
    %23 = arith.cmpi eq, %21, %22 : vector<128x128xi32>
    %cst_14 = arith.constant dense<true> : vector<128x128xi1>
    %24 = arith.xori %23, %cst_14 : vector<128x128xi1>
    %c128_i32 = arith.constant 128 : i32
    %25 = arith.muli %arg1, %c128_i32 : i32
    %26 = tpu.iota {dimensions = array<i32: 0>} : vector<128x1xi32>
    %27 = vector.broadcast %25 : i32 to vector<128x1xi32>
    %28 = arith.addi %27, %26 : vector<128x1xi32>
    %c8_i32 = arith.constant 8 : i32
    %29 = vector.broadcast %c8_i32 : i32 to vector<128x1xi32>
    %30 = arith.cmpi slt, %28, %29 : vector<128x1xi32>
    %c128_i32_15 = arith.constant 128 : i32
    %31 = arith.muli %arg0, %c128_i32_15 : i32
    %32 = tpu.iota {dimensions = array<i32: 1>} : vector<1x128xi32>
    %33 = vector.broadcast %31 : i32 to vector<1x128xi32>
    %34 = arith.addi %33, %32 : vector<1x128xi32>
    %c8_i32_16 = arith.constant 8 : i32
    %35 = vector.broadcast %c8_i32_16 : i32 to vector<1x128xi32>
    %36 = arith.cmpi slt, %34, %35 : vector<1x128xi32>
    %37 = vector.broadcast %30 : vector<128x1xi1> to vector<128x128xi1>
    %38 = vector.broadcast %36 : vector<1x128xi1> to vector<128x128xi1>
    %39 = arith.andi %37, %38 : vector<128x128xi1>
    %40 = arith.andi %23, %39 : vector<128x128xi1>
    %41 = arith.andi %24, %39 : vector<128x128xi1>
    %c0_17 = arith.constant 0 : index
    %c0_18 = arith.constant 0 : index
    %42 = vector.load %arg6[%c0_17, %c0_18] : memref<1x128xf32, #tpu.memory_space<vmem>>, vector<1x128xf32>
    %cst_19 = arith.constant 0.000000e+00 : f32
    %43 = vector.broadcast %cst_19 : f32 to vector<128x128xf32>
    %44 = arith.select %40, %11, %43 : vector<128x128xi1>, vector<128x128xf32>
    %cst_20 = arith.constant dense<0.000000e+00> : vector<128xf32>
    %45 = vector.multi_reduction <add>, %44, %cst_20 [0] : vector<128x128xf32> to vector<128xf32>
    %46 = vector.shape_cast %45 : vector<128xf32> to vector<1x128xf32>
    %47 = arith.addf %42, %46 : vector<1x128xf32>
    %c0_21 = arith.constant 0 : index
    %c0_22 = arith.constant 0 : index
    %48 = vector.load %arg6[%c0_21, %c0_22] : memref<1x128xf32, #tpu.memory_space<vmem>>, vector<1x128xf32>
    tpu.vector_store %arg6[%c0_21, %c0_22], %47 {strides = array<i32>} : memref<1x128xf32, #tpu.memory_space<vmem>>, vector<1x128xf32>,
    %c0_23 = arith.constant 0 : index
    %c0_24 = arith.constant 0 : index
    %49 = vector.load %arg7[%c0_23, %c0_24] : memref<1x128xf32, #tpu.memory_space<vmem>>, vector<1x128xf32>
    %50 = arith.mulf %18, %18 : vector<128x128xf32>
    %cst_25 = arith.constant 0.000000e+00 : f32
    %51 = vector.broadcast %cst_25 : f32 to vector<128x128xf32>
    %52 = arith.select %41, %50, %51 : vector<128x128xi1>, vector<128x128xf32>
    %cst_26 = arith.constant dense<0.000000e+00> : vector<128xf32>
    %53 = vector.multi_reduction <add>, %52, %cst_26 [0] : vector<128x128xf32> to vector<128xf32>
    %54 = vector.shape_cast %53 : vector<128xf32> to vector<1x128xf32>
    %55 = arith.addf %49, %54 : vector<1x128xf32>
    %c0_27 = arith.constant 0 : index
    %c0_28 = arith.constant 0 : index
    %56 = vector.load %arg7[%c0_27, %c0_28] : memref<1x128xf32, #tpu.memory_space<vmem>>, vector<1x128xf32>
    tpu.vector_store %arg7[%c0_27, %c0_28], %55 {strides = array<i32>} : memref<1x128xf32, #tpu.memory_space<vmem>>, vector<1x128xf32>,
    return
  }
  func.func @transform_0(%arg0: i32, %arg1: i32) -> (i32, i32) {
    %c0_i32 = arith.constant 0 : i32
    %c0_i32_0 = arith.constant 0 : i32
    return %arg1, %c0_i32 : i32, i32
  }
  func.func @transform_1(%arg0: i32, %arg1: i32) -> (i32, i32) {
    %c0_i32 = arith.constant 0 : i32
    %c0_i32_0 = arith.constant 0 : i32
    return %arg0, %c0_i32 : i32, i32
  }
  func.func @transform_2(%arg0: i32, %arg1: i32) -> (i32, i32) {
    %c0_i32 = arith.constant 0 : i32
    %c0_i32_0 = arith.constant 0 : i32
    return %arg1, %c0_i32 : i32, i32
  }
  func.func @transform_3(%arg0: i32, %arg1: i32) -> (i32, i32) {
    %c0_i32 = arith.constant 0 : i32
    %c0_i32_0 = arith.constant 0 : i32
    return %c0_i32, %arg0 : i32, i32
  }
  func.func @transform_4(%arg0: i32, %arg1: i32) -> (i32, i32) {
    %c0_i32 = arith.constant 0 : i32
    %c0_i32_0 = arith.constant 0 : i32
    return %c0_i32, %arg0 : i32, i32
  }
  func.func @transform_5(%arg0: i32, %arg1: i32) -> (i32, i32) {
    %c0_i32 = arith.constant 0 : i32
    %c0_i32_0 = arith.constant 0 : i32
    return %c0_i32, %arg0 : i32, i32
  }
}

</mosaic_0001>

<bundles_post_ra>
// kernel: tpu_custom_call.1
= control target key start
LH: loop header
LB: loop body
LE: loop exit
PB: predicated region body
PF: predicated region fallthrough
CT: control target
= control target key end

     0   :  { %11 = vsyncpa [#allocation3], 0  ;;  %vm140_vm0 = vcmask 261120   ;;  %v1035_v3 = vmov 0   ;;  %s1195_s0 = inlined_call_operand.vmem [shape: bf16[128,32], index: 0, kind: input, shape index: {}]   ;;  %s1196_s1 = inlined_call_operand.vmem [shape: bf16[128,32], index: 1, kind: input, shape index: {}]   ;;  %s1197_s2 = inlined_call_operand.vmem [shape: s32[128,1], index: 2, kind: input, shape index: {}]   ;;  %s1198_s3 = inlined_call_operand.vmem [shape: s32[1,128], index: 3, kind: input, shape index: {}]   ;;  %s1199_s4 = inlined_call_operand.hbm [shape: f32[1,128], index: 4, kind: output, shape index: {0}]   ;;  %s1200_s5 = inlined_call_operand.hbm [shape: f32[1,128], index: 5, kind: output, shape index: {1}]  }
   0x1   :  { %v969_v0 = vld [vmem:[%s1196_s1] sm:$0xff]   ;;  %v970_v1 = vld [vmem:[%s1196_s1 + $0x8] sm:$0xff]   ;;  %968 = vset.pattern.permute.xlu0 %v1035_v3  ;;  %v971_v4 = vld [vmem:[%s1196_s1 + $0x10] sm:$0xff]  }
   0x2   :  { %947 = vmatprep.subr.msk.bf16.mxu0 %vm140_vm0, %v969_v0  ;;  %v166_v2 = vsel %vm140_vm0, %v969_v0, 0  ;;  %948 = vmatprep.subr.msk.bf16.mxu1 %vm140_vm0, %v969_v0  ;;  %v169_v5 = vsel %vm140_vm0, %v970_v1, 0  ;;  %v977_v6 = vld [vmem:[%s1195_s0] sm:$0xff]   ;;  %v172_v8 = vsel %vm140_vm0, %v971_v4, 0  ;;  %v972_v9 = vld [vmem:[%s1196_s1 + $0x18] sm:$0xff]  }
   0x3   :  { %900 = vmatpush3.bf16.xpose.msra.mxu0 %v166_v2  ;;  %939 = vmatpush3.bf16.xpose.msra.mxu1 %v166_v2  ;;  %v979_v7 = vld [vmem:[%s1195_s0 + $0x20] sm:$0xff]  }
   0x4   :  { %949 = vmatprep.subr.msk.bf16.mxu0 %vm140_vm0, %v970_v1  ;;  %950 = vmatprep.subr.msk.bf16.mxu1 %vm140_vm0, %v970_v1  ;;  %v494_v10 = vld [vmem:[%s1197_s2] sm:$0xff] }
   0x5   :  { %915 = vmatprep.mubr.msk.bf16.mxu0 %vm140_vm0, %v977_v6  ;;  %923 = vmatprep.mubr.msk.bf16.mxu1 %vm140_vm0, %v979_v7 }
   0xb   :  { %902 = vmatpush3.bf16.xpose.msra.mxu0 %v169_v5  ;;  %940 = vmatpush3.bf16.xpose.msra.mxu1 %v169_v5 }
   0xc   :  { %951 = vmatprep.subr.msk.bf16.mxu0 %vm140_vm0, %v971_v4  ;;  %952 = vmatprep.subr.msk.bf16.mxu1 %vm140_vm0, %v971_v4 }
   0xd   :  { %12 = vsyncpa [#allocation5], 0  ;;  %512 = vperm.xlu0 %968, %v494_v10   ;;  %v175_v11 = vsel %vm140_vm0, %v972_v9, 0  ;;  %v973_v12 = vld [vmem:[%s1196_s1 + $0x20] sm:$0xff]   ;;  %v974_v14 = vld [vmem:[%s1196_s1 + $0x28] sm:$0xff]   ;;  %v1036_v26 = vmov 0.0   ;;  %v647_v27 = vlaneseq }
   0xe   :  { %v178_v13 = vsel %vm140_vm0, %v973_v12, 0  ;;  %v181_v15 = vsel %vm140_vm0, %v974_v14, 0  ;;  %v975_v16 = vld [vmem:[%s1196_s1 + $0x30] sm:$0xff]   ;;  %v976_v18 = vld [vmem:[%s1196_s1 + $0x38] sm:$0xff]   ;;  %v978_v20 = vld [vmem:[%s1195_s0 + $0x8] sm:$0xff]   ;;  %vm1038_vm6 = vmmov 1  }
   0xf   :  { %v184_v17 = vsel %vm140_vm0, %v975_v16, 0  ;;  %v187_v19 = vsel %vm140_vm0, %v976_v18, 0  ;;  %v980_v21 = vld [vmem:[%s1195_s0 + $0x28] sm:$0xff]   ;;  %v981_v22 = vld [vmem:[%s1195_s0 + $0x10] sm:$0xff]   ;;  %v983_v24 = vld [vmem:[%s1195_s0 + $0x18] sm:$0xff]   ;;  %v1153_v28 = vand.u32 127, %v647_v27 }
  0x10   :  { %v982_v23 = vld [vmem:[%s1195_s0 + $0x30] sm:$0xff]   ;;  %v984_v25 = vld [vmem:[%s1195_s0 + $0x38] sm:$0xff]   ;;  %26 = vst [vmem:[#allocation2] sm:$0x1] %v1036_v26  ;;  %27 = vst [vmem:[#allocation4] sm:$0x1] %v1036_v26 }
  0x11   :  { %v882_v31 = vld [vmem:[%s1198_s3] ss:$0 sm:$0xff]  ;;  %vm651_vm1 = vcmp.lt.s32.totalorder %v1153_v28, 8  ;;  %s1037_s0 = smov [#allocation2]  }
  0x12   :  { %s836_s3 = sshll.u32 %s1037_s0, 4  ;;  %s837_s3 = int_to_ptr.vmem [resolvable:$true] %s836_s3 }
  0x13   :  { %904 = vmatpush3.bf16.xpose.msra.mxu0 %v172_v8  ;;  %941 = vmatpush3.bf16.xpose.msra.mxu1 %v172_v8  ;;  %s987_s27 = scalar_lea.vmem %s837_s3, 16  ;;  %s991_s28 = scalar_lea.vmem %s837_s3, 32 }
  0x14   :  { %953 = vmatprep.subr.msk.bf16.mxu0 %vm140_vm0, %v972_v9  ;;  %954 = vmatprep.subr.msk.bf16.mxu1 %vm140_vm0, %v972_v9  ;;  %p988_p0 = scmp.ne.s32.totalorder %s837_s3, %s987_s27  ;;  %p992_p1 = scmp.lt.s32.totalorder %s837_s3, %s837_s3 }
  0x15   :  { %p993_p2 = scmp.lt.s32.totalorder %s991_s28, %s987_s27 }
  0x17   :  { %v734_v58 = vld [vmem:[#allocation2] sm:$0x1]  ;;  %p994_p3 = por %p993_p2, %p992_p1 }
  0x19   :  { %p995_p4 = pnand %p994_p3, %p988_p0 }
  0x1b   :  { %906 = vmatpush3.bf16.xpose.msra.mxu0 %v175_v11  ;;  %942 = vmatpush3.bf16.xpose.msra.mxu1 %v175_v11 }
  0x1c   :  { %955 = vmatprep.subr.msk.bf16.mxu0 %vm140_vm0, %v973_v12  ;;  %956 = vmatprep.subr.msk.bf16.mxu1 %vm140_vm0, %v973_v12 }
  0x23   :  { %908 = vmatpush3.bf16.xpose.msra.mxu0 %v178_v13  ;;  %943 = vmatpush3.bf16.xpose.msra.mxu1 %v178_v13 }
  0x24   :  { %957 = vmatprep.subr.msk.bf16.mxu0 %vm140_vm0, %v974_v14  ;;  %958 = vmatprep.subr.msk.bf16.mxu1 %vm140_vm0, %v974_v14 }
  0x2b   :  { %910 = vmatpush3.bf16.xpose.msra.mxu0 %v181_v15  ;;  %944 = vmatpush3.bf16.xpose.msra.mxu1 %v181_v15 }
  0x2c   :  { %959 = vmatprep.subr.msk.bf16.mxu0 %vm140_vm0, %v975_v16  ;;  %960 = vmatprep.subr.msk.bf16.mxu1 %vm140_vm0, %v975_v16 }
  0x33   :  { %912 = vmatpush3.bf16.xpose.msra.mxu0 %v184_v17  ;;  %945 = vmatpush3.bf16.xpose.msra.mxu1 %v184_v17 }
  0x34   :  { %961 = vmatprep.subr.msk.bf16.mxu0 %vm140_vm0, %v976_v18  ;;  %962 = vmatprep.subr.msk.bf16.mxu1 %vm140_vm0, %v976_v18 }
  0x3b   :  { %914 = vmatpush3.bf16.xpose.msra.mxu0 %v187_v19  ;;  %946 = vmatpush3.bf16.xpose.msra.mxu1 %v187_v19 }
  0x42   :  { %916 = vmatmul.mubr.msk.bf16.vlgmr.msra.gmra.mrb[0].mxu0 %vm140_vm0, %v978_v20  ;;  %924 = vmatmul.mubr.msk.bf16.vlgmr.msra.gmra.mrb[0].mxu1 %vm140_vm0, %v980_v21 }
  0x43   :  { %919 = vmatprep.mubr.msk.bf16.mxu0 %vm140_vm0, %v981_v22  ;;  %927 = vmatprep.mubr.msk.bf16.mxu1 %vm140_vm0, %v982_v23 }
  0x4a   :  { %920 = vmatmul.mubr.msk.bf16.gmra.mrb[4].mxu0 %vm140_vm0, %v983_v24  ;;  %928 = vmatmul.mubr.msk.bf16.gmra.mrb[4].mxu1 %vm140_vm0, %v984_v25 }
  0x8c   :  { %v513_v29 = vpop.permute.xlu0 %512 }
  0x8d   :  { %vm563_vm2 = vcmp.eq.s32.totalorder %v513_v29, %v882_v31 }
  0x8e   :  { %vm702_vm3 = vmand %vm563_vm2, %vm651_vm1 }
  0x8f   :  { %vm1163_vm7 = vmxor %vm563_vm2, %vm1038_vm6 }
 0x115   :  { %v917_v30 = vpop.f32.mrb[0].mxu0  ;;  %v925_v32 = vpop.f32.mrb[0].mxu1 }
 0x116   :  { %v223_v33 = vpop.f32.mrb[1].mxu0  ;;  %v255_v34 = vpop.f32.mrb[1].mxu1 }
 0x117   :  { %v286_v35 = vmul.f32 2.0, %v223_v33  ;;  %v918_v36 = vpop.f32.mrb[2].mxu0  ;;  %v926_v37 = vpop.f32.mrb[2].mxu1 }
 0x118   :  { %v226_v38 = vpop.f32.mrb[3].mxu0  ;;  %v258_v39 = vpop.f32.mrb[3].mxu1 }
 0x119   :  { %v302_v40 = vsub.f32 2.0, %v286_v35 }
 0x11b   :  { %v318_v41 = vmax.f32 %v302_v40, 0.0 }
 0x11d   :  { %985 = vrsqrt.f32 %v318_v41  ;;  %v921_v42 = vpop.f32.mrb[4].mxu0  ;;  %v929_v43 = vpop.f32.mrb[4].mxu1  ;;  %v735_v44 = vsel %vm702_vm3, %v318_v41, 0.0  ;;  %vm336_vm4 = vcmp.eq.f32.partialorder %v318_v41, inf  ;;  %v339_v59 = vand.u32 2147483648, %v318_v41 }
 0x11e   :  { %v239_v45 = vpop.f32.mrb[5].mxu0  ;;  %v271_v46 = vpop.f32.mrb[5].mxu1  ;;  %v766_v47 = vrot.slane %v735_v44, 4  ;;  %vm338_vm5 = vcmp.eq.f32.partialorder %v318_v41, 0.0 }
 0x11f   :  { %v922_v48 = vpop.f32.mrb[6].mxu0  ;;  %v930_v49 = vpop.f32.mrb[6].mxu1 }
 0x120   :  { %v242_v50 = vpop.f32.mrb[7].mxu0  ;;  %v274_v51 = vpop.f32.mrb[7].mxu1  ;;  %v767_v52 = vadd.f32 %v766_v47, %v735_v44 }
 0x122   :  { %v768_v53 = vrot.slane %v767_v52, 2 }
 0x124   :  { %v769_v54 = vadd.f32 %v768_v53, %v767_v52 }
 0x126   :  { %v770_v56 = vrot.slane %v769_v54, 1 }
 0x127   :  { %v986_v55 = vpop.eup %985 }
 0x128   :  { %v335_v57 = vmul.f32 %v986_v55, %v318_v41  ;;  %v771_v60 = vadd.f32 %v770_v56, %v769_v54 }
 0x12a   :  { %v337_v61 = vsel %vm336_vm4, %v318_v41, %v335_v57  ;;  %v772_v63 = vadd.f32 %v771_v60, %v734_v58 }
 0x12b   :  { %v340_v62 = vsel %vm338_vm5, %v339_v59, %v337_v61 }
 0x12c   :  { %v446_v0 = vadd.f32 1e-06, %v340_v62  ;;  %773 = vst [vmem:[#allocation2] sm:$0x1] %v772_v63 }
 0x12e   :  { %v462_v1 = vsub.f32 1.0, %v446_v0 }
 0x12f   :  { %998 = shalt.err (!%p995_p4)
}
 0x130   :  { %s999_s6 = scalar_lea.hbm %s1199_s4, 16 }
 0x131   :  { %p1000_p5 = scmp.ne.s32.totalorder %s1199_s4, %s999_s6  ;;  %p1003_p6 = scmp.lt.u32.totalorder %s999_s6, %s1199_s4 }
 0x133   :  { %p1005_p7 = pnand %p1003_p6, %p1000_p5 }
 0x135   :  { %1008 = shalt.err (!%p1005_p7)
}
 0x136   :  { %839 = dma.vmem_to_hbm [thread:$0]  %s837_s3, 16, %s1199_s4, [#allocation3]   ;;  %v478_v3 = vmax.f32 %v462_v1, 1e-06  ;;  %vm718_vm8 = vmand %vm1163_vm7, %vm651_vm1  ;;  %v774_v11 = vld [vmem:[#allocation4] sm:$0x1] }
 0x137   :  { %s1039_s12 = smov [#allocation4]  }
 0x138   :  { %v775_v4 = vmul.f32 %v478_v3, %v478_v3  ;;  %s846_s13 = sshll.u32 %s1039_s12, 4  ;;  %s847_s13 = int_to_ptr.vmem [resolvable:$true] %s846_s13 }
 0x139   :  { %s1009_s4 = scalar_lea.vmem %s847_s13, 16  ;;  %s1013_s14 = scalar_lea.vmem %s847_s13, 32 }
 0x13a   :  { %v791_v5 = vsel %vm718_vm8, %v775_v4, 0.0  ;;  %p1010_p8 = scmp.ne.s32.totalorder %s847_s13, %s1009_s4  ;;  %p1014_p9 = scmp.lt.s32.totalorder %s847_s13, %s847_s13 }
 0x13b   :  { %v822_v6 = vrot.slane %v791_v5, 4  ;;  %p1015_p10 = scmp.lt.s32.totalorder %s1013_s14, %s1009_s4 }
 0x13d   :  { %v823_v7 = vadd.f32 %v822_v6, %v791_v5  ;;  %p1016_p11 = por %p1015_p10, %p1014_p9 }
 0x13f   :  { %v824_v8 = vrot.slane %v823_v7, 2  ;;  %p1017_p12 = pnand %p1016_p11, %p1010_p8 }
 0x141   :  { %v825_v9 = vadd.f32 %v824_v8, %v823_v7 }
 0x143   :  { %v826_v10 = vrot.slane %v825_v9, 1 }
 0x145   :  { %v827_v12 = vadd.f32 %v826_v10, %v825_v9 }
 0x147   :  { %v828_v13 = vadd.f32 %v827_v12, %v774_v11 }
 0x149   :  { %829 = vst [vmem:[#allocation4] sm:$0x1] %v828_v13 }
 0x14a   :  { %1020 = shalt.err (!%p1017_p12)
}
 0x14b   :  { %s1021_s17 = scalar_lea.hbm %s1200_s5, 16 }
 0x14c   :  { %p1022_p13 = scmp.ne.s32.totalorder %s1200_s5, %s1021_s17  ;;  %p1025_p0 = scmp.lt.u32.totalorder %s1021_s17, %s1200_s5 }
 0x14e   :  { %p1027_p1 = pnand %p1025_p0, %p1022_p13 }
 0x150   :  { %1030 = shalt.err (!%p1027_p1)
}
 0x151   :  { %849 = dma.vmem_to_hbm [thread:$0]  %s847_s13, 16, %s1200_s5, [#allocation5]  }
 0x152   :  { %1031 = dma.done.wait [#allocation3], 16  }
 0x153   :  { %1032 = vsyncadd [#allocation3], 4294967280 }
 0x154   :  { %1033 = dma.done.wait [#allocation5], 16  }
 0x155   :  { %1034 = vsyncadd [#allocation5], 4294967280 }
 0x156   :  { %856 = vsyncpa [#allocation3], 1 }
 0x157   :  { %857 = vsyncpa [#allocation5], 1 }

</bundles_post_ra>
